<compile_context>
chip_gen: v6e
topology: v6e:2x2x1
jax: 0.10.0
libtpu: 0.0.40
codegen_flags: <defaults>
</compile_context>

<pallas_src>
import functools

import jax
import jax.numpy as jnp
from jax import lax
from jax.experimental import pallas as pl
from jax.experimental.pallas import tpu as pltpu


def _attention_kernel(h_ref, w1_ref, b1_ref, w2_ref, b2_ref,
                      s_ref, mmax_ref, lsum_ref, m_ref,
                      m_scr, l_scr, acc_scr,
                      *, n_valid, block_n, needs_mask):
    i = pl.program_id(0)

    @pl.when(i == 0)
    def _():
        m_scr[...] = jnp.full_like(m_scr, -jnp.inf)
        l_scr[...] = jnp.zeros_like(l_scr)
        acc_scr[...] = jnp.zeros_like(acc_scr)

    h = h_ref[...]                                    # (block_n, L), native dtype

    # Hidden layer: tanh(H @ W1 + b1), MXU matmul with f32 accumulate, f32 math.
    hid = jnp.tanh(
        jnp.dot(h, w1_ref[...], preferred_element_type=jnp.float32)
        + b1_ref[...]
    )                                                 # (block_n, D) f32

    # Scores directly in lane-dense (K, block_n) layout: contract D.
    scores = lax.dot_general(
        w2_ref[...], hid, (((0,), (1,)), ((), ())),
        preferred_element_type=jnp.float32,
    ) + b2_ref[...]                                   # (K, block_n) f32

    if needs_mask:
        col = i * block_n + lax.broadcasted_iota(jnp.int32, scores.shape, 1)
        scores = jnp.where(col < n_valid, scores, jnp.float32(-1e30))

    # Raw (masked) scores go out lane-dense; global normalisation in wrapper.
    s_ref[...] = scores

    # Online softmax update of running max / denominator / M accumulator.
    tile_max = jnp.max(scores, axis=-1, keepdims=True)          # (K, 1)
    m_new = jnp.maximum(m_scr[...], tile_max)
    alpha = jnp.exp(m_scr[...] - m_new)
    p = jnp.exp(scores - m_new)                                 # (K, block_n) f32
    l_scr[...] = alpha * l_scr[...] + jnp.sum(p, axis=-1, keepdims=True)
    acc_scr[...] = alpha * acc_scr[...] + jnp.dot(
        p.astype(h.dtype), h, preferred_element_type=jnp.float32)
    m_scr[...] = m_new

    @pl.when(i == pl.num_programs(0) - 1)
    def _():
        inv_l = pl.reciprocal(l_scr[...], approx=True)          # EUP slot, ~free
        m_ref[...] = acc_scr[...] * inv_l                       # (K, L)
        mmax_ref[...] = m_scr[...]
        lsum_ref[...] = l_scr[...]


def attention_layer_forward(features, w1, b1, w2, b2, input_dims, *, block_n=1024):
    """Pallas implementation of AttentionLayer.forward.

    features: any shape reshaped to (N, input_dims); kept in its native dtype
              (no f32 copy is materialised).
    w1: (L, D) = torch W1.T, b1: (D,), w2: (D, K) = torch W2.T, b2: (K,).
    Returns (A, M): A (K, N) f32 softmax weights, M (K, L) f32.
    """
    H = jnp.reshape(features, (-1, input_dims))       # (N, L), no upcast
    N, L = H.shape
    D = w1.shape[-1]
    K = w2.shape[-1]

    # Tile size on the instance axis: multiple of 128 (lane width), clamped so
    # tiny bags still run a single block.  At L=32 a 1024-row bf16 tile is
    # 64 KiB; double-buffered H tiles + resident weights + (K, L) accumulator
    # fit trivially in the 32 MiB scoped-VMEM budget (safe on v7x's 64 MiB).
    block_n = max(128, (block_n // 128) * 128)
    block_n = min(block_n, pl.cdiv(N, 128) * 128)
    n_pad = pl.cdiv(N, block_n) * block_n
    grid = (n_pad // block_n,)

    if n_pad != N:
        H = jnp.pad(H, ((0, n_pad - N), (0, 0)))

    # Low-precision operands only feed the MXU; bias/softmax math stays f32.
    w1 = w1.astype(H.dtype)
    b1_2d = jnp.reshape(b1, (1, D)).astype(jnp.float32)
    w2_f32 = w2.astype(jnp.float32)                   # tiny (D, K), keep f32
    b2_2d = jnp.reshape(b2, (K, 1)).astype(jnp.float32)

    kernel = functools.partial(
        _attention_kernel, n_valid=N, block_n=block_n, needs_mask=(n_pad != N))

    scores, m_fin, l_fin, M = pl.pallas_call(
        kernel,
        out_shape=(
            jax.ShapeDtypeStruct((K, n_pad), jnp.float32),   # raw scores (lane dense)
            jax.ShapeDtypeStruct((K, 1), jnp.float32),       # final running max
            jax.ShapeDtypeStruct((K, 1), jnp.float32),       # final sum of exp
            jax.ShapeDtypeStruct((K, L), jnp.float32),       # M
        ),
        grid_spec=pltpu.PrefetchScalarGridSpec(
            num_scalar_prefetch=0,
            grid=grid,
            in_specs=[
                pl.BlockSpec((block_n, L), lambda i: (i, 0)),   # streamed H tiles
                pl.BlockSpec((L, D), lambda i: (0, 0)),         # resident weights
                pl.BlockSpec((1, D), lambda i: (0, 0)),
                pl.BlockSpec((D, K), lambda i: (0, 0)),
                pl.BlockSpec((K, 1), lambda i: (0, 0)),
            ],
            out_specs=(
                pl.BlockSpec((K, block_n), lambda i: (0, i)),
                pl.BlockSpec((K, 1), lambda i: (0, 0)),
                pl.BlockSpec((K, 1), lambda i: (0, 0)),
                pl.BlockSpec((K, L), lambda i: (0, 0)),
            ),
            scratch_shapes=[
                pltpu.VMEM((K, 1), jnp.float32),   # running max
                pltpu.VMEM((K, 1), jnp.float32),   # running sum of exp
                pltpu.VMEM((K, L), jnp.float32),   # M accumulator
            ],
        ),
        compiler_params=pltpu.CompilerParams(
            dimension_semantics=("arbitrary",),     # softmax reduction over N
            vmem_limit_bytes=32 * 1024 * 1024,
        ),
    )(H, w1, b1_2d, w2_f32, b2_2d)

    # Epilogue: global softmax normalisation of A — tiny (K, N) elementwise op
    # using the kernel's final max / denominator (exact over all tiles).
    A = jnp.exp(scores[:, :N] - m_fin) / l_fin
    return A, M


def _reference(features, w1, b1, w2, b2, input_dims):
    H = jnp.reshape(features, (-1, input_dims)).astype(jnp.float32)
    s = jnp.tanh(H @ w1.astype(jnp.float32) + b1.astype(jnp.float32))
    s = s @ w2.astype(jnp.float32) + b2.astype(jnp.float32)     # (N, K)
    A = jax.nn.softmax(s.T, axis=1)                             # (K, N)
    M = A @ H                                                   # (K, L)
    return A, M


if __name__ == "__main__":
    # Module-consistent small shapes: input_dims L=32, hidden_dims D=16, K=1.
    input_dims, hidden_dims, attention_dims = 32, 16, 1

    key = jax.random.PRNGKey(0)
    k_feat, k_w1, k_b1, k_w2, k_b2 = jax.random.split(key, 5)

    # MIL-style bags: 2 bags x 150 instances of 32 features -> N = 300 rows.
    # bf16 features: the kernel streams H in its native dtype (no f32 copy).
    features = jax.random.normal(k_feat, (2, 150, input_dims), dtype=jnp.bfloat16)

    # Parameters stored transposed to (in, out) so the kernel does plain H @ W
    # (PyTorch nn.Linear stores (out, in)).
    w1 = jax.random.normal(k_w1, (input_dims, hidden_dims), dtype=jnp.float32) * 0.1
    b1 = jax.random.normal(k_b1, (hidden_dims,), dtype=jnp.float32) * 0.1
    w2 = jax.random.normal(k_w2, (hidden_dims, attention_dims), dtype=jnp.float32) * 0.1
    b2 = jax.random.normal(k_b2, (attention_dims,), dtype=jnp.float32) * 0.1

    # block_n=128 keeps the demo multi-tile (300 -> 3 tiles, last one masked),
    # exercising the online softmax; real bags should use the 1024-row default.
    A, M = attention_layer_forward(features, w1, b1, w2, b2, input_dims,
                                   block_n=128)
    A, M = jax.block_until_ready((A, M))

    A_ref, M_ref = _reference(features, w1, b1, w2, b2, input_dims)

    N = 2 * 150
    assert A.shape == (attention_dims, N) and M.shape == (attention_dims, input_dims)
    # bf16 MXU operands + approx reciprocal => looser tolerance than pure f32.
    assert jnp.allclose(A, A_ref, atol=1e-3, rtol=2e-2), float(jnp.max(jnp.abs(A - A_ref)))
    assert jnp.allclose(M, M_ref, atol=5e-3, rtol=2e-2), float(jnp.max(jnp.abs(M - M_ref)))

    print("KERNEL_OK")
</pallas_src>

<mosaic_0001>
module attributes {stable_mosaic.version = 11 : i64} {
  func.func @_attention_kernel(%arg0: i32, %arg1: memref<128x32xbf16, #tpu.memory_space<vmem>>, %arg2: memref<32x16xbf16, #tpu.memory_space<vmem>>, %arg3: memref<1x16xf32, #tpu.memory_space<vmem>>, %arg4: memref<16x1xf32, #tpu.memory_space<vmem>>, %arg5: memref<1x1xf32, #tpu.memory_space<vmem>>, %arg6: memref<1x128xf32, #tpu.memory_space<vmem>>, %arg7: memref<1x1xf32, #tpu.memory_space<vmem>>, %arg8: memref<1x1xf32, #tpu.memory_space<vmem>>, %arg9: memref<1x32xf32, #tpu.memory_space<vmem>>, %arg10: memref<1x1xf32, #tpu.memory_space<vmem>>, %arg11: memref<1x1xf32, #tpu.memory_space<vmem>>, %arg12: memref<1x32xf32, #tpu.memory_space<vmem>>) attributes {dimension_semantics = [#tpu.dimension_semantics<arbitrary>], iteration_bounds = array<i64: 3>, scalar_prefetch = 0 : i64, scratch_operands = 3 : i64, tpu.core_type = #tpu.core_type<tc>, window_params = [{transform_indices = @transform_0, window_bounds = array<i64: 128, 32>}, {pipeline_mode = #tpu.pipeline_mode<synchronous>, transform_indices = @transform_1, window_bounds = array<i64: 32, 16>}, {pipeline_mode = #tpu.pipeline_mode<synchronous>, transform_indices = @transform_2, window_bounds = array<i64: 1, 16>}, {pipeline_mode = #tpu.pipeline_mode<synchronous>, transform_indices = @transform_3, window_bounds = array<i64: 16, 1>}, {pipeline_mode = #tpu.pipeline_mode<synchronous>, transform_indices = @transform_4, window_bounds = array<i64: 1, 1>}, {transform_indices = @transform_5, window_bounds = array<i64: 1, 128>}, {pipeline_mode = #tpu.pipeline_mode<synchronous>, transform_indices = @transform_6, window_bounds = array<i64: 1, 1>}, {pipeline_mode = #tpu.pipeline_mode<synchronous>, transform_indices = @transform_7, window_bounds = array<i64: 1, 1>}, {pipeline_mode = #tpu.pipeline_mode<synchronous>, transform_indices = @transform_8, window_bounds = array<i64: 1, 32>}]} {
    %c0_i32 = arith.constant 0 : i32
    %0 = arith.cmpi eq, %arg0, %c0_i32 : i32
    %1 = arith.extui %0 : i1 to i32
    %c0_i32_0 = arith.constant 0 : i32
    %2 = arith.cmpi ne, %1, %c0_i32_0 : i32
    scf.if %2 {
      %cst_32 = arith.constant 0xFF800000 : f32
      %51 = vector.broadcast %cst_32 : f32 to vector<1x1xf32>
      %c0_33 = arith.constant 0 : index
      %c0_34 = arith.constant 0 : index
      %52 = vector.load %arg10[%c0_33, %c0_34] : memref<1x1xf32, #tpu.memory_space<vmem>>, vector<1x1xf32>
      tpu.vector_store %arg10[%c0_33, %c0_34], %51 {strides = array<i32>} : memref<1x1xf32, #tpu.memory_space<vmem>>, vector<1x1xf32>,
      %cst_35 = arith.constant 0.000000e+00 : f32
      %53 = vector.broadcast %cst_35 : f32 to vector<1x1xf32>
      %c0_36 = arith.constant 0 : index
      %c0_37 = arith.constant 0 : index
      %54 = vector.load %arg11[%c0_36, %c0_37] : memref<1x1xf32, #tpu.memory_space<vmem>>, vector<1x1xf32>
      tpu.vector_store %arg11[%c0_36, %c0_37], %53 {strides = array<i32>} : memref<1x1xf32, #tpu.memory_space<vmem>>, vector<1x1xf32>,
      %cst_38 = arith.constant 0.000000e+00 : f32
      %55 = vector.broadcast %cst_38 : f32 to vector<1x32xf32>
      %c0_39 = arith.constant 0 : index
      %c0_40 = arith.constant 0 : index
      %56 = vector.load %arg12[%c0_39, %c0_40] : memref<1x32xf32, #tpu.memory_space<vmem>>, vector<1x32xf32>
      tpu.vector_store %arg12[%c0_39, %c0_40], %55 {strides = array<i32>} : memref<1x32xf32, #tpu.memory_space<vmem>>, vector<1x32xf32>,
    } else {
    }
    %c0 = arith.constant 0 : index
    %c0_1 = arith.constant 0 : index
    %3 = vector.load %arg1[%c0, %c0_1] : memref<128x32xbf16, #tpu.memory_space<vmem>>, vector<128x32xbf16>
    %c0_2 = arith.constant 0 : index
    %c0_3 = arith.constant 0 : index
    %4 = vector.load %arg2[%c0_2, %c0_3] : memref<32x16xbf16, #tpu.memory_space<vmem>>, vector<32x16xbf16>
    %cst = arith.constant dense<0.000000e+00> : vector<128x16xf32>
    %5 = tpu.matmul %3, %4, %cst {dimension_numbers = #tpu.dot_dimension_numbers<[1], [0], [0], [1], [0, 0, 1, 1], [], []>} : vector<128x32xbf16>, vector<32x16xbf16>, vector<128x16xf32> -> vector<128x16xf32>
    %c0_4 = arith.constant 0 : index
    %c0_5 = arith.constant 0 : index
    %6 = vector.load %arg3[%c0_4, %c0_5] : memref<1x16xf32, #tpu.memory_space<vmem>>, vector<1x16xf32>
    %7 = vector.broadcast %6 : vector<1x16xf32> to vector<128x16xf32>
    %8 = arith.addf %5, %7 : vector<128x16xf32>
    %9 = math.tanh %8 : vector<128x16xf32>
    %c0_6 = arith.constant 0 : index
    %c0_7 = arith.constant 0 : index
    %10 = vector.load %arg4[%c0_6, %c0_7] : memref<16x1xf32, #tpu.memory_space<vmem>>, vector<16x1xf32>
    %cst_8 = arith.constant dense<0.000000e+00> : vector<1x128xf32>
    %11 = tpu.matmul %10, %9, %cst_8 {dimension_numbers = #tpu.dot_dimension_numbers<[0], [1], [1], [0], [0, 1, 1, 0], [], []>} : vector<16x1xf32>, vector<128x16xf32>, vector<1x128xf32> -> vector<1x128xf32>
    %c0_9 = arith.constant 0 : index
    %c0_10 = arith.constant 0 : index
    %12 = vector.load %arg5[%c0_9, %c0_10] : memref<1x1xf32, #tpu.memory_space<vmem>>, vector<1x1xf32>
    %13 = vector.broadcast %12 : vector<1x1xf32> to vector<1x128xf32>
    %14 = arith.addf %11, %13 : vector<1x128xf32>
    %c128_i32 = arith.constant 128 : i32
    %15 = arith.muli %arg0, %c128_i32 : i32
    %16 = tpu.iota {dimensions = array<i32: 1>} : vector<1x128xi32>
    %17 = vector.broadcast %15 : i32 to vector<1x128xi32>
    %18 = arith.addi %17, %16 : vector<1x128xi32>
    %c300_i32 = arith.constant 300 : i32
    %19 = vector.broadcast %c300_i32 : i32 to vector<1x128xi32>
    %20 = arith.cmpi slt, %18, %19 : vector<1x128xi32>
    %cst_11 = arith.constant -1.000000e+30 : f32
    %21 = vector.broadcast %cst_11 : f32 to vector<1x128xf32>
    %22 = arith.select %20, %14, %21 : vector<1x128xi1>, vector<1x128xf32>
    %c0_12 = arith.constant 0 : index
    %c0_13 = arith.constant 0 : index
    %23 = vector.load %arg6[%c0_12, %c0_13] : memref<1x128xf32, #tpu.memory_space<vmem>>, vector<1x128xf32>
    tpu.vector_store %arg6[%c0_12, %c0_13], %22 {strides = array<i32>} : memref<1x128xf32, #tpu.memory_space<vmem>>, vector<1x128xf32>,
    %cst_14 = arith.constant dense<0xFF800000> : vector<1xf32>
    %24 = vector.multi_reduction <maximumf>, %22, %cst_14 [1] : vector<1x128xf32> to vector<1xf32>
    %25 = vector.shape_cast %24 : vector<1xf32> to vector<1x1xf32>
    %c0_15 = arith.constant 0 : index
    %c0_16 = arith.constant 0 : index
    %26 = vector.load %arg10[%c0_15, %c0_16] : memref<1x1xf32, #tpu.memory_space<vmem>>, vector<1x1xf32>
    %27 = arith.maximumf %26, %25 : vector<1x1xf32>
    %c0_17 = arith.constant 0 : index
    %c0_18 = arith.constant 0 : index
    %28 = vector.load %arg10[%c0_17, %c0_18] : memref<1x1xf32, #tpu.memory_space<vmem>>, vector<1x1xf32>
    %29 = arith.subf %28, %27 : vector<1x1xf32>
    %30 = math.exp %29 : vector<1x1xf32>
    %31 = vector.broadcast %27 : vector<1x1xf32> to vector<1x128xf32>
    %32 = arith.subf %22, %31 : vector<1x128xf32>
    %33 = math.exp %32 : vector<1x128xf32>
    %c0_19 = arith.constant 0 : index
    %c0_20 = arith.constant 0 : index
    %34 = vector.load %arg11[%c0_19, %c0_20] : memref<1x1xf32, #tpu.memory_space<vmem>>, vector<1x1xf32>
    %35 = arith.mulf %30, %34 : vector<1x1xf32>
    %cst_21 = arith.constant dense<0.000000e+00> : vector<1xf32>
    %36 = vector.multi_reduction <add>, %33, %cst_21 [1] : vector<1x128xf32> to vector<1xf32>
    %37 = vector.shape_cast %36 : vector<1xf32> to vector<1x1xf32>
    %38 = arith.addf %35, %37 : vector<1x1xf32>
    %c0_22 = arith.constant 0 : index
    %c0_23 = arith.constant 0 : index
    %39 = vector.load %arg11[%c0_22, %c0_23] : memref<1x1xf32, #tpu.memory_space<vmem>>, vector<1x1xf32>
    tpu.vector_store %arg11[%c0_22, %c0_23], %38 {strides = array<i32>} : memref<1x1xf32, #tpu.memory_space<vmem>>, vector<1x1xf32>,
    %c0_24 = arith.constant 0 : index
    %c0_25 = arith.constant 0 : index
    %40 = vector.load %arg12[%c0_24, %c0_25] : memref<1x32xf32, #tpu.memory_space<vmem>>, vector<1x32xf32>
    %41 = vector.broadcast %30 : vector<1x1xf32> to vector<1x32xf32>
    %42 = arith.mulf %41, %40 : vector<1x32xf32>
    %43 = arith.truncf %33 : vector<1x128xf32> to vector<1x128xbf16>
    %cst_26 = arith.constant dense<0.000000e+00> : vector<1x32xf32>
    %44 = tpu.matmul %43, %3, %cst_26 {dimension_numbers = #tpu.dot_dimension_numbers<[1], [0], [0], [1], [0, 0, 1, 1], [], []>} : vector<1x128xbf16>, vector<128x32xbf16>, vector<1x32xf32> -> vector<1x32xf32>
    %45 = arith.addf %42, %44 : vector<1x32xf32>
    %c0_27 = arith.constant 0 : index
    %c0_28 = arith.constant 0 : index
    %46 = vector.load %arg12[%c0_27, %c0_28] : memref<1x32xf32, #tpu.memory_space<vmem>>, vector<1x32xf32>
    tpu.vector_store %arg12[%c0_27, %c0_28], %45 {strides = array<i32>} : memref<1x32xf32, #tpu.memory_space<vmem>>, vector<1x32xf32>,
    %c0_29 = arith.constant 0 : index
    %c0_30 = arith.constant 0 : index
    %47 = vector.load %arg10[%c0_29, %c0_30] : memref<1x1xf32, #tpu.memory_space<vmem>>, vector<1x1xf32>
    tpu.vector_store %arg10[%c0_29, %c0_30], %27 {strides = array<i32>} : memref<1x1xf32, #tpu.memory_space<vmem>>, vector<1x1xf32>,
    %c2_i32 = arith.constant 2 : i32
    %48 = arith.cmpi eq, %arg0, %c2_i32 : i32
    %49 = arith.extui %48 : i1 to i32
    %c0_i32_31 = arith.constant 0 : i32
    %50 = arith.cmpi ne, %49, %c0_i32_31 : i32
    scf.if %50 {
      %c0_32 = arith.constant 0 : index
      %c0_33 = arith.constant 0 : index
      %51 = vector.load %arg11[%c0_32, %c0_33] : memref<1x1xf32, #tpu.memory_space<vmem>>, vector<1x1xf32>
      %52 = tpu.reciprocal %51 {approx = true} : vector<1x1xf32> -> vector<1x1xf32>
      %c0_34 = arith.constant 0 : index
      %c0_35 = arith.constant 0 : index
      %53 = vector.load %arg12[%c0_34, %c0_35] : memref<1x32xf32, #tpu.memory_space<vmem>>, vector<1x32xf32>
      %54 = vector.broadcast %52 : vector<1x1xf32> to vector<1x32xf32>
      %55 = arith.mulf %53, %54 : vector<1x32xf32>
      %c0_36 = arith.constant 0 : index
      %c0_37 = arith.constant 0 : index
      %56 = vector.load %arg9[%c0_36, %c0_37] : memref<1x32xf32, #tpu.memory_space<vmem>>, vector<1x32xf32>
      tpu.vector_store %arg9[%c0_36, %c0_37], %55 {strides = array<i32>} : memref<1x32xf32, #tpu.memory_space<vmem>>, vector<1x32xf32>,
      %c0_38 = arith.constant 0 : index
      %c0_39 = arith.constant 0 : index
      %57 = vector.load %arg10[%c0_38, %c0_39] : memref<1x1xf32, #tpu.memory_space<vmem>>, vector<1x1xf32>
      %c0_40 = arith.constant 0 : index
      %c0_41 = arith.constant 0 : index
      %58 = vector.load %arg7[%c0_40, %c0_41] : memref<1x1xf32, #tpu.memory_space<vmem>>, vector<1x1xf32>
      tpu.vector_store %arg7[%c0_40, %c0_41], %57 {strides = array<i32>} : memref<1x1xf32, #tpu.memory_space<vmem>>, vector<1x1xf32>,
      %c0_42 = arith.constant 0 : index
      %c0_43 = arith.constant 0 : index
      %59 = vector.load %arg11[%c0_42, %c0_43] : memref<1x1xf32, #tpu.memory_space<vmem>>, vector<1x1xf32>
      %c0_44 = arith.constant 0 : index
      %c0_45 = arith.constant 0 : index
      %60 = vector.load %arg8[%c0_44, %c0_45] : memref<1x1xf32, #tpu.memory_space<vmem>>, vector<1x1xf32>
      tpu.vector_store %arg8[%c0_44, %c0_45], %59 {strides = array<i32>} : memref<1x1xf32, #tpu.memory_space<vmem>>, vector<1x1xf32>,
    } else {
    }
    return
  }
  func.func @transform_0(%arg0: i32) -> (i32, i32) {
    %c0_i32 = arith.constant 0 : i32
    %c0_i32_0 = arith.constant 0 : i32
    return %arg0, %c0_i32 : i32, i32
  }
  func.func @transform_1(%arg0: i32) -> (i32, i32) {
    %c0_i32 = arith.constant 0 : i32
    %c0_i32_0 = arith.constant 0 : i32
    %c0_i32_1 = arith.constant 0 : i32
    return %c0_i32, %c0_i32_0 : i32, i32
  }
  func.func @transform_2(%arg0: i32) -> (i32, i32) {
    %c0_i32 = arith.constant 0 : i32
    %c0_i32_0 = arith.constant 0 : i32
    %c0_i32_1 = arith.constant 0 : i32
    return %c0_i32, %c0_i32_0 : i32, i32
  }
  func.func @transform_3(%arg0: i32) -> (i32, i32) {
    %c0_i32 = arith.constant 0 : i32
    %c0_i32_0 = arith.constant 0 : i32
    %c0_i32_1 = arith.constant 0 : i32
    return %c0_i32, %c0_i32_0 : i32, i32
  }
  func.func @transform_4(%arg0: i32) -> (i32, i32) {
    %c0_i32 = arith.constant 0 : i32
    %c0_i32_0 = arith.constant 0 : i32
    %c0_i32_1 = arith.constant 0 : i32
    return %c0_i32, %c0_i32_0 : i32, i32
  }
  func.func @transform_5(%arg0: i32) -> (i32, i32) {
    %c0_i32 = arith.constant 0 : i32
    %c0_i32_0 = arith.constant 0 : i32
    return %c0_i32, %arg0 : i32, i32
  }
  func.func @transform_6(%arg0: i32) -> (i32, i32) {
    %c0_i32 = arith.constant 0 : i32
    %c0_i32_0 = arith.constant 0 : i32
    %c0_i32_1 = arith.constant 0 : i32
    return %c0_i32, %c0_i32_0 : i32, i32
  }
  func.func @transform_7(%arg0: i32) -> (i32, i32) {
    %c0_i32 = arith.constant 0 : i32
    %c0_i32_0 = arith.constant 0 : i32
    %c0_i32_1 = arith.constant 0 : i32
    return %c0_i32, %c0_i32_0 : i32, i32
  }
  func.func @transform_8(%arg0: i32) -> (i32, i32) {
    %c0_i32 = arith.constant 0 : i32
    %c0_i32_0 = arith.constant 0 : i32
    %c0_i32_1 = arith.constant 0 : i32
    return %c0_i32, %c0_i32_0 : i32, i32
  }
}

</mosaic_0001>

<bundles_post_ra>
// kernel: tpu_custom_call.1
= control target key start
LH: loop header
LB: loop body
LE: loop exit
PB: predicated region body
PF: predicated region fallthrough
CT: control target
= control target key end

     0   :  { %s1690_s0 = inlined_call_operand.vmem [shape: bf16[384,32], index: 0, kind: input, shape index: {}]   ;;  %s1691_s1 = inlined_call_operand.vmem [shape: bf16[32,16], index: 1, kind: input, shape index: {}]   ;;  %s1692_s2 = inlined_call_operand.vmem [shape: f32[1,16], index: 2, kind: input, shape index: {}]   ;;  %s1693_s3 = inlined_call_operand.vmem [shape: f32[16,1], index: 3, kind: input, shape index: {}]   ;;  %s1694_s4 = inlined_call_operand.<no memory space> [shape: f32[1,1], index: 4, kind: input, shape index: {}]   ;;  %s1695_s5 = inlined_call_operand.hbm [shape: f32[1,384], index: 5, kind: output, shape index: {0}]   ;;  %s1696_s6 = inlined_call_operand.hbm [shape: f32[1,1], index: 6, kind: output, shape index: {1}]   ;;  %s1697_s7 = inlined_call_operand.hbm [shape: f32[1,1], index: 7, kind: output, shape index: {2}]   ;;  %s1698_s8 = inlined_call_operand.hbm [shape: f32[1,32], index: 8, kind: output, shape index: {3}]  }
   0x1   :  { %v14_v0 = vstv %s1694_s4 }
   0x2   :  { %15 = vst [vmem:[#allocation5] sm:$0x1] %v14_v0 }
   0x3   :  { %16 = vsyncpa [#allocation7], 0 }
   0x4   :  { %18 = vsyncpa [#allocation7 + $0x1], 0 }
   0x5   :  { %19 = vsyncpa [#allocation9], 0 }
   0x6   :  { %20 = vsyncpa [#allocation12], 0  ;;  %s1432_s29 = smov 0   ;;  %s1434_s30 = smov 0  }
   0x7   :  { %s1436_s9 = smov 0   ;;  %s1438_s10 = smov 0  }
   0x8 LB: > { %s1453_s4 = sadd.s32 4294967295, %s1372_s10   ;;  %s950_s11 = sadd.s32 4294967294, %s1372_s10   ;;  %s1372_s10 = sphi %s1438_s10, %s1704_s10   ;;  %s1368_s9 = sphi %s1436_s9, %s1703_s9   ;;  %s1364_s30 = sphi %s1434_s30, %s1702_s30   ;;  %s1360_s29 = sphi %s1432_s29, %s1701_s29  }
   0x9   : > { %s1457_s12 = sadd.s32 1, %s1372_s10   ;;  %s143_s13 = sadd.s32 1, %s1368_s9 }
   0xa   : > { %s140_s14 = ssub.s32 %s1372_s10, %s1457_s12  ;;  %p153_p0 = scmp.ne.s32.totalorder %s1368_s9, %s1364_s30 }
   0xb   : > { %p141_p1 = scmp.eq.s32.totalorder %s140_s14, 0  ;;  %p154_p2 = scmp.eq.s32.totalorder %s1453_s4, 2 }
   0xc   : > { %p159_p3 = scmp.ne.s32.totalorder %s1364_s30, %s1360_s29  ;;  %p160_p4 = scmp.eq.s32.totalorder %s950_s11, 2 }
   0xd   : > { %s1468_s15 = scalar_select %p141_p1, %s1368_s9, %s143_s13  }
   0xe   : > { %p1472_p5 = por %p154_p2, %p153_p0  ;;  %p1476_p6 = por %p160_p4, %p159_p3 }
   0xf   : > { %p953_p7 = scmp.ge.s32.totalorder %s1372_s10, 1  ;;  %p262_p8 = scmp.lt.s32.totalorder %s1372_s10, 4 }
  0x11   : > { %p263_p9 = pnand %p953_p7, %p262_p8 }
  0x12   : > { %s287_s18 = sand.u32 (!%p263_p9), 1, %s1364_s30   ;;  %s1484_s19 = sshll.u32 (!%p263_p9), %s1453_s4, 4 }
  0x13   : > { %266 = sbr.rel (%p263_p9) target bundleno = 1231 (0x4cf), region = 40  ;;  %p296_p10 = scmp.lt.s32.totalorder (!%p263_p9), %s1484_s19, 47 }
  0x14   : > { %s1495_s25 = scalar_lea.vmem (!%p263_p9), [#allocation6], %s287_s18  ;;  %p956_p11 = scmp.ne.s32.totalorder (!%p263_p9), %s1453_s4, 0 }
  0x18   : > { %s297_s20 = scalar_select %p296_p10, %s1484_s19, 47 }
  0x19   : > { %305 = sbr.rel (%p956_p11) target bundleno = 33 (0x21), region = 44 }
  0x1a   : > { %s955_s21 = sshll.u32 %s297_s20, 2 }
  0x1b   : > { %s1491_s24 = scalar_lea.vmem %s1690_s0, %s955_s21 }
  0x1e   : > { %vm306_vm0 = vcmask 0   ;;  %vm309_vm1 = vcmask 253952   ;;  %v1374_v1 = vmov -inf   ;;  %v1375_v2 = vmov 0.0  }
  0x1f   : > { %307 = vst.msk [vmem:[#allocation2] sm:$0x1] %vm306_vm0, %v1374_v1  ;;  %308 = vst.msk [vmem:[#allocation3] sm:$0x1] %vm306_vm0, %v1375_v2 }
  0x20   : > { %310 = vst.msk [vmem:[#allocation4] sm:$0x1] %vm309_vm1, %v1375_v2 }
  0x21 PF: > { %v1183_v3 = vld [vmem:[%s1691_s1 + $0x8] sm:$0xff]   ;;  %v1184_v4 = vld [vmem:[%s1691_s1] sm:$0xff]   ;;  %vm390_vm2 = vcmask 261120   ;;  %v1187_v7 = vld [vmem:[%s1491_s24 + $0x10] sm:$0xff]   ;;  %v1376_v15 = vmov 0.0   ;;  %vm1377_vm3 = vmmov 0  }
  0x22   : > { %1040 = vmatprep.subr.bf16.mxu0 %v1183_v3  ;;  %v1185_v5 = vld [vmem:[%s1491_s24] sm:$0xff]   ;;  %v1186_v6 = vld [vmem:[%s1491_s24 + $0x8] sm:$0xff]   ;;  %v1188_v10 = vld [vmem:[%s1491_s24 + $0x18] sm:$0xff]   ;;  %1060 = vmatprep.subr.mxu1 %v1376_v15  ;;  %v1378_v17 = vmov 0   ;;  %vm572_vm4 = vcmask 130048   ;;  %vm702_vm6 = vcmask 1040384  }
  0x23   : > { %1041 = vmatpush3.bf16.msra.mxu0 %v1183_v3  ;;  %1044 = vmatprep.mubr.msk.bf16.mxu0 %vm390_vm2, %v1185_v5  ;;  %v528_v8 = vld [vmem:[%s1693_s3] sm:$0xff]  ;;  %v529_v9 = vld [vmem:[%s1693_s3 + $0x8] sm:$0xff]  ;;  %v1191_v13 = vld [vmem:[%s1491_s24 + $0x30] sm:$0xff]   ;;  %vm729_vm7 = vcmask 0   ;;  %vm792_vm8 = vcmask 253952   ;;  %p994_p12 = scmp.ne.s32.totalorder %s1453_s4, 2 }
  0x24   : > { %1042 = vmatprep.subr.bf16.mxu0 %v1184_v4  ;;  %540 = vxpose.xlu0.b32.start [1/2] (short) (narrow) %v528_v8, 8  ;;  %v1189_v11 = vld [vmem:[%s1491_s24 + $0x20] sm:$0xff]   ;;  %v1190_v12 = vld [vmem:[%s1491_s24 + $0x28] sm:$0xff]   ;;  %v1192_v14 = vld [vmem:[%s1491_s24 + $0x38] sm:$0xff]   ;;  %s993_s24 = sshll.u32 %s1453_s4, 7 }
  0x25   : > { %1092 = vmatprep.mubr.msk.f32.mxu1 %vm1377_vm3, %v1376_v15  ;;  %v530_v16 = vld [vmem:[#allocation5] sm:$0x1]  ;;  %1181 = vset.pattern.permute.xlu1 %v1378_v17  ;;  %v1548_v32 = vld [vmem:[%s1692_s2] ss:$0 sm:$0xff]  ;;  %v697_v8 = vstv %s993_s24 }
  0x26   : > { %533 = vperm.xlu1 %1181, %v530_v16  }
  0x27   : > { %1043 = vmatpush3.bf16.msra.mxu0 %v1184_v4  ;;  %v536_v4 = vlaneseq }
  0x28   : > { %541 = vxpose.xlu0.b32.end [2/2] (short) (narrow) %v529_v9, 8  ;;  %1095 = vmatprep.subr.bf16.mxu0 %v1376_v15 }
  0x2a   : > { %1045 = vmatmul.mubr.msk.bf16.vlgmr.msra.gmra.mxu0 %vm390_vm2, %v1186_v6 }
  0x2b   : > { %1048 = vmatprep.mubr.msk.bf16.mxu0 %vm390_vm2, %v1187_v7  ;;  %1096 = vmatpush3.bf16.msra.mxu0 %v1192_v14 }
  0x2c   : > { %1097 = vmatprep.subr.bf16.mxu0 %v1376_v15 }
  0x2f   : > { %1098 = vmatpush3.bf16.msra.mxu0 %v1191_v13 }
  0x30   : > { %1099 = vmatprep.subr.bf16.mxu0 %v1376_v15 }
  0x32   : > { %1049 = vmatmul.mubr.msk.bf16.gmra.mxu0 %vm390_vm2, %v1188_v10 }
  0x33   : > { %1052 = vmatprep.mubr.msk.bf16.mxu0 %vm390_vm2, %v1189_v11  ;;  %1100 = vmatpush3.bf16.msra.mxu0 %v1190_v12 }
  0x34   : > { %1101 = vmatprep.subr.bf16.mxu0 %v1376_v15 }
  0x37   : > { %1102 = vmatpush3.bf16.msra.mxu0 %v1189_v11 }
  0x38   : > { %1103 = vmatprep.subr.bf16.mxu0 %v1376_v15 }
  0x3a   : > { %1053 = vmatmul.mubr.msk.bf16.gmra.mxu0 %vm390_vm2, %v1190_v12 }
  0x3b   : > { %1056 = vmatprep.mubr.msk.bf16.mxu0 %vm390_vm2, %v1191_v13  ;;  %1104 = vmatpush3.bf16.msra.mxu0 %v1188_v10 }
  0x3c   : > { %1105 = vmatprep.subr.bf16.mxu0 %v1376_v15 }
  0x3f   : > { %1106 = vmatpush3.bf16.msra.mxu0 %v1187_v7 }
  0x40   : > { %1107 = vmatprep.subr.bf16.mxu0 %v1376_v15 }
  0x42   : > { %1057 = vmatmul.mubr.msk.bf16.gmra.mxu0 %vm390_vm2, %v1192_v14 }
  0x43   : > { %1108 = vmatpush3.bf16.msra.mxu0 %v1186_v6  ;;  %1111 = vmatprep.mubr.msk.bf16.mxu0 %vm1377_vm3, %v1376_v15  ;;  %v696_v6 = vand.u32 127, %v536_v4 }
  0x44   : > { %1109 = vmatprep.subr.bf16.mxu0 %v1376_v15 }
  0x45   : > { %v698_v10 = vadd.s32 %v697_v8, %v696_v6 }
  0x47   : > { %1110 = vmatpush3.bf16.msra.mxu0 %v1185_v5  ;;  %v537_v5 = vshrl.u32 %v536_v4, 7  ;;  %vm699_vm5 = vcmp.lt.s32.totalorder %v698_v10, 300 }
  0x49   : > { %v1603_v7 = vsub.s32 0, %v537_v5 }
  0x51   : > { %1182 = vset.pattern.permute.xlu0 %v1378_v17  ;;  %v706_v17 = vld [vmem:[#allocation2] sm:$0x1] }
  0xa0   : > { %v556_v3 = vpop.trf.xlu0 }
  0xa1   : > { %v534_v9 = vpop.permute.xlu1 %533 }
  0xa2   : > { %v539_v11 = vrot.slane %v534_v9, %v1603_v7 }
  0xea   : > { %v1537_v18 = vpop.f32.mrf.mxu0 }
  0xeb   : > { %v458_v57 = vadd.f32 %v1537_v18, %v1548_v32 }
  0xec   : > { %v1539_v19 = vpop.f32.mrf.mxu0 }
  0xed   : > { %v450_v61 = vadd.f32 %v1548_v32, %v1539_v19 }
  0xee   : > { %v1541_v20 = vpop.f32.mrf.mxu0 }
  0xef   : > { %v461_v55 = vadd.f32 %v1541_v20, %v1548_v32 }
  0xf0   : > { %v1543_v21 = vpop.f32.mrf.mxu0 }
  0xf1   : > { %v453_v59 = vadd.f32 %v1548_v32, %v1543_v21 }
  0xf2   : > { %v1050_v22 = vpop.f32.mrf.mxu0 }
  0xf3   : > { %v474_v49 = vadd.f32 %v1050_v22, %v1548_v32 }
  0xf4   : > { %v465_v23 = vpop.f32.mrf.mxu0 }
  0xf5   : > { %v466_v53 = vadd.f32 %v1548_v32, %v465_v23 }
  0xf6   : > { %v1051_v24 = vpop.f32.mrf.mxu0 }
  0xf7   : > { %v477_v47 = vadd.f32 %v1051_v24, %v1548_v32 }
  0xf8   : > { %v468_v25 = vpop.f32.mrf.mxu0 }
  0xf9   : > { %v469_v51 = vadd.f32 %v1548_v32, %v468_v25 }
  0xfa   : > { %v1054_v26 = vpop.f32.mrf.mxu0 }
  0xfb   : > { %v490_v41 = vadd.f32 %v1054_v26, %v1548_v32 }
  0xfc   : > { %v481_v27 = vpop.f32.mrf.mxu0 }
  0xfd   : > { %v482_v45 = vadd.f32 %v1548_v32, %v481_v27 }
  0xfe   : > { %v1055_v28 = vpop.f32.mrf.mxu0 }
  0xff   : > { %v493_v39 = vadd.f32 %v1055_v28, %v1548_v32 }
 0x100   : > { %v484_v29 = vpop.f32.mrf.mxu0 }
 0x101   : > { %v485_v43 = vadd.f32 %v1548_v32, %v484_v29 }
 0x102   : > { %v1058_v30 = vpop.f32.mrf.mxu0 }
 0x103   : > { %v506_v35 = vadd.f32 %v1058_v30, %v1548_v32  ;;  %v723_v30 = vld [vmem:[#allocation3] sm:$0x1] }
 0x104   : > { %v497_v31 = vpop.f32.mrf.mxu0 }
 0x105   : > { %v498_v38 = vadd.f32 %v1548_v32, %v497_v31 }
 0x106   : > { %v1059_v33 = vpop.f32.mrf.mxu0 }
 0x107   : > { %v509_v34 = vadd.f32 %v1059_v33, %v1548_v32 }
 0x108   : > { %v500_v36 = vpop.f32.mrf.mxu0 }
 0x109   : > { %1193 = vtanh.f32 %v509_v34  ;;  %v501_v37 = vadd.f32 %v1548_v32, %v500_v36  ;;  %v731_v36 = vld [vmem:[#allocation4] sm:$0x1] }
 0x10a   : > { %1195 = vtanh.f32 %v506_v35 }
 0x10b   : > { %1197 = vtanh.f32 %v501_v37 }
 0x10c   : > { %1199 = vtanh.f32 %v498_v38 }
 0x10d   : > { %1201 = vtanh.f32 %v493_v39 }
 0x10e   : > { %1203 = vtanh.f32 %v490_v41 }
 0x10f   : > { %1205 = vtanh.f32 %v485_v43 }
 0x110   : > { %1207 = vtanh.f32 %v482_v45 }
 0x111   : > { %1209 = vtanh.f32 %v477_v47 }
 0x112   : > { %1211 = vtanh.f32 %v474_v49 }
 0x113   : > { %1213 = vtanh.f32 %v469_v51 }
 0x114   : > { %1215 = vtanh.f32 %v466_v53 }
 0x115   : > { %1217 = vtanh.f32 %v461_v55 }
 0x116   : > { %v1194_v40 = vpop.eup %1193  ;;  %1219 = vtanh.f32 %v458_v57 }
 0x117   : > { %1061 = vmatpush3.xpose.msk.msra.mxu1 %vm572_vm4, %v1194_v40  ;;  %v1196_v42 = vpop.eup %1195  ;;  %1221 = vtanh.f32 %v453_v59 }
 0x118   : > { %1062 = vmatprep.subr.mxu1 %v1376_v15  ;;  %v1198_v44 = vpop.eup %1197  ;;  %1223 = vtanh.f32 %v450_v61 }
 0x119   : > { %v1200_v46 = vpop.eup %1199 }
 0x11a   : > { %v1202_v48 = vpop.eup %1201 }
 0x11b   : > { %1063 = vmatpush3.xpose.msk.msra.mxu1 %vm572_vm4, %v1196_v42  ;;  %v1204_v50 = vpop.eup %1203 }
 0x11c   : > { %1064 = vmatprep.subr.mxu1 %v1376_v15  ;;  %v1206_v52 = vpop.eup %1205 }
 0x11d   : > { %v1208_v54 = vpop.eup %1207 }
 0x11e   : > { %v1210_v56 = vpop.eup %1209 }
 0x11f   : > { %1065 = vmatpush3.xpose.msk.msra.mxu1 %vm572_vm4, %v1198_v44  ;;  %v1212_v58 = vpop.eup %1211 }
 0x120   : > { %1066 = vmatprep.subr.mxu1 %v1376_v15  ;;  %v1214_v60 = vpop.eup %1213 }
 0x121   : > { %v1216_v62 = vpop.eup %1215 }
 0x122   : > { %v1218_v63 = vpop.eup %1217 }
 0x123   : > { %1067 = vmatpush3.xpose.msk.msra.mxu1 %vm572_vm4, %v1200_v46  ;;  %v1220_v0 = vpop.eup %1219 }
 0x124   : > { %1068 = vmatprep.subr.mxu1 %v1376_v15  ;;  %v1222_v1 = vpop.eup %1221 }
 0x125   : > { %v1224_v2 = vpop.eup %1223 }
 0x127   : > { %1069 = vmatpush3.xpose.msk.msra.mxu1 %vm572_vm4, %v1202_v48 }
 0x128   : > { %1070 = vmatprep.subr.mxu1 %v1376_v15 }
 0x12b   : > { %1071 = vmatpush3.xpose.msk.msra.mxu1 %vm572_vm4, %v1204_v50 }
 0x12c   : > { %1072 = vmatprep.subr.mxu1 %v1376_v15 }
 0x12f   : > { %1073 = vmatpush3.xpose.msk.msra.mxu1 %vm572_vm4, %v1206_v52 }
 0x130   : > { %1074 = vmatprep.subr.mxu1 %v1376_v15 }
 0x133   : > { %1075 = vmatpush3.xpose.msk.msra.mxu1 %vm572_vm4, %v1208_v54 }
 0x134   : > { %1076 = vmatprep.subr.mxu1 %v1376_v15 }
 0x137   : > { %1077 = vmatpush3.xpose.msk.msra.mxu1 %vm572_vm4, %v1210_v56 }
 0x138   : > { %1078 = vmatprep.subr.mxu1 %v1376_v15 }
 0x13b   : > { %1079 = vmatpush3.xpose.msk.msra.mxu1 %vm572_vm4, %v1212_v58 }
 0x13c   : > { %1080 = vmatprep.subr.mxu1 %v1376_v15 }
 0x13f   : > { %1081 = vmatpush3.xpose.msk.msra.mxu1 %vm572_vm4, %v1214_v60 }
 0x140   : > { %1082 = vmatprep.subr.mxu1 %v1376_v15 }
 0x143   : > { %1083 = vmatpush3.xpose.msk.msra.mxu1 %vm572_vm4, %v1216_v62 }
 0x144   : > { %1084 = vmatprep.subr.mxu1 %v1376_v15 }
 0x147   : > { %1085 = vmatpush3.xpose.msk.msra.mxu1 %vm572_vm4, %v1218_v63 }
 0x148   : > { %1086 = vmatprep.subr.mxu1 %v1376_v15 }
 0x14b   : > { %1087 = vmatpush3.xpose.msk.msra.mxu1 %vm572_vm4, %v1220_v0 }
 0x14c   : > { %1088 = vmatprep.subr.mxu1 %v1376_v15 }
 0x14f   : > { %1089 = vmatpush3.xpose.msk.msra.mxu1 %vm572_vm4, %v1222_v1 }
 0x150   : > { %1090 = vmatprep.subr.mxu1 %v1376_v15 }
 0x153   : > { %1091 = vmatpush3.xpose.msk.msra.mxu1 %vm572_vm4, %v1224_v2 }
 0x156   : > { %1093 = vmatmul.mubr.msk.f32.vlgmr.msra.gmra.mxu1 %vm572_vm4, %v556_v3 }
 0x216   : > { %v690_v12 = vpop.f32.mrf.mxu1 }
 0x217   : > { %v691_v13 = vadd.f32 %v690_v12, %v539_v11 }
 0x218   : > { %v1094_v14 = vpop.f32.mrf.mxu1 }
 0x219   : > { %v700_v15 = vsel %vm699_vm5, %v691_v13, -1e+30 }
 0x21a   : > { %701 = vst [vmem:[%s1495_s25] sm:$0x1] %v700_v15  ;;  %v703_v16 = vsel %vm702_vm6, %v700_v15, -inf }
 0x21b   : > { %704 = vmax.xlane.f32.xlu1 %v703_v16 }
 0x2a4   : > { %v705_v18 = vpop.xlane.xlu1 %704 }
 0x2a5   : > { %v707_v19 = vmax.f32 %v706_v17, %v705_v18 }
 0x2a7   : > { %v708_v20 = vsub.f32 %v706_v17, %v707_v19  ;;  %794 = vst.msk [vmem:[#allocation2] sm:$0x1] %vm729_vm7, %v707_v19  ;;  %713 = vperm.xlu0 %1182, %v707_v19  }
 0x2a9   : > { %v709_v26 = vmul.f32 1.442695, %v708_v20 }
 0x322   : > { %v714_v21 = vpop.permute.xlu0 %713 }
 0x323   : > { %v719_v22 = vrot.slane %v714_v21, %v1603_v7 }
 0x325   : > { %v720_v23 = vsub.f32 %v700_v15, %v719_v22 }
 0x327   : > { %v721_v24 = vmul.f32 1.442695, %v720_v23 }
 0x329   : > { %1225 = vpow2.f32 %v721_v24 }
 0x32a   : > { %1227 = vpow2.f32 %v709_v26 }
 0x336   : > { %v1226_v25 = vpop.eup %1225 }
 0x337   : > { %v725_v27 = vsel %vm702_vm6, %v1226_v25, 0.0  ;;  %v742_v28 = vpack.c.bf16 %v1226_v25, %v1226_v25  ;;  %v1228_v29 = vpop.eup %1227 }
 0x338   : > { %726 = vadd.xlane.f32.xlu1 %v725_v27  ;;  %v724_v31 = vmul.f32 %v1228_v29, %v723_v30 }
 0x339   : > { %1112 = vmatmul.mubr.bf16.vlgmr.msra.gmra.mxu0 %v742_v28 }
 0x349   : > { %734 = vperm.xlu1 %1181, %v1228_v29  }
 0x3c1   : > { %v727_v32 = vpop.xlane.xlu1 %726 }
 0x3c2   : > { %v728_v33 = vadd.f32 %v727_v32, %v724_v31 }
 0x3c4   : > { %730 = vst.msk [vmem:[#allocation3] sm:$0x1] %vm729_vm7, %v728_v33 }
 0x3c5   : > { %v735_v34 = vpop.permute.xlu1 %734 }
 0x3c6   : > { %v740_v35 = vrot.slane %v735_v34, %v1603_v7 }
 0x3c8   : > { %v741_v37 = vmul.f32 %v740_v35, %v731_v36 }
 0x3f9   : > { %v785_v38 = vpop.f32.mrf.mxu0 }
 0x3fa   : > { %v791_v39 = vadd.f32 %v785_v38, %v741_v37 }
 0x3fb   : > { %v1113_v40 = vpop.f32.mrf.mxu0  ;;  %798 = sbr.rel (%p994_p12) target bundleno = 1168 (0x490), region = 48 }
 0x3fc   : > { %793 = vst.msk [vmem:[#allocation4] sm:$0x1] %vm792_vm8, %v791_v39 }
 0x3fd   : > { %v788_v41 = vpop.f32.mrf.mxu0 }
 0x3ff   : > { %v1114_v42 = vpop.f32.mrf.mxu0 }
 0x400   : > { %v799_v43 = vld [vmem:[#allocation3] sm:$0x1]  ;;  %v1379_v44 = vmov 0   ;;  %v813_v46 = vld [vmem:[#allocation2] sm:$0x1] }
 0x401   : > { %1229 = vset.pattern.permute.xlu0 %v1379_v44  ;;  %1230 = vrcp.f32 %v799_v43  ;;  %v815_v47 = vld [vmem:[#allocation3] sm:$0x1]  ;;  %814 = vst.msk [vmem:[#allocation8] sm:$0x1] %vm729_vm7, %v813_v46 }
 0x402   : > { %816 = vst.msk [vmem:[#allocation10] sm:$0x1] %vm729_vm7, %v815_v47 }
 0x403   : > { %v801_v48 = vld [vmem:[#allocation4] sm:$0x1] }
 0x40e   : > { %v1231_v45 = vpop.eup %1230 }
 0x40f   : > { %804 = vperm.xlu0 %1229, %v1231_v45  }
 0x48a   : > { %v805_v49 = vpop.permute.xlu0 %804 }
 0x48b   : > { %v810_v50 = vrot.slane %v805_v49, %v1603_v7 }
 0x48d   : > { %v811_v51 = vmul.f32 %v810_v50, %v801_v48 }
 0x48f   : > { %812 = vst.msk [vmem:[#allocation11] sm:$0x1] %vm792_vm8, %v811_v51 }
 0x490 PF: > { %s1380_s26 = smov [#allocation8]   ;;  %s1623_s13 = scalar_lea.hbm %s1695_s5, %s1484_s19 }
 0x491   : > { %s841_s27 = sshll.u32 %s1380_s26, 4  ;;  %s830_s14 = sshll.u32 %s1495_s25, 4  ;;  %s842_s27 = int_to_ptr.vmem [resolvable:$true] %s841_s27  ;;  %s831_s14 = int_to_ptr.vmem [resolvable:$true] %s830_s14 }
 0x492   : > { %s1232_s20 = scalar_lea.vmem %s842_s27, 16  ;;  %s1238_s21 = scalar_lea.vmem %s842_s27, 32 }
 0x493   : > { %p1233_p13 = scmp.ne.s32.totalorder %s842_s27, %s1232_s20  ;;  %p1239_p3 = scmp.lt.s32.totalorder %s842_s27, %s842_s27 }
 0x494   : > { %p1240_p4 = scmp.lt.s32.totalorder %s1238_s21, %s1232_s20 }
 0x495   : > { %p1234_p0 = pnand %p1233_p13, %p154_p2 }
 0x496   : > { %p1241_p7 = por %p1240_p4, %p1239_p3 }
 0x497   : > { %p1235_p1 = pneg %p1234_p0 }
 0x499   : > { %p1242_p8 = pnand %p1241_p7, %p1235_p1 }
 0x49b   : > { %1245 = shalt.err (!%p1242_p8)
}
 0x49c   : > { %1117 = dma.vmem_to_hbm [thread:$0]  (%p154_p2), %s842_s27, 16, %s1696_s6, [#allocation9]  }
 0x49d   : > { %s818_s19 = scalar_lea.sflag [#allocation7], %s287_s18  ;;  %s1256_s25 = scalar_lea.vmem %s831_s14, 16 }
 0x49e   : > { %p1257_p9 = scmp.ne.s32.totalorder %s831_s14, %s1256_s25  ;;  %s1381_s24 = smov [#allocation6]  }
 0x49f   : > { %s1260_s26 = sshll.u32 %s1381_s24, 4  ;;  %s1261_s26 = int_to_ptr.vmem [resolvable:$false] %s1260_s26 }
 0x4a0   : > { %p1258_p10 = pnand %p1257_p9, %p1472_p5  ;;  %s1262_s28 = scalar_lea.vmem %s1261_s26, 32 }
 0x4a1   : > { %p1263_p12 = scmp.lt.s32.totalorder %s831_s14, %s1261_s26  ;;  %p1264_p13 = scmp.lt.s32.totalorder %s1262_s28, %s1256_s25 }
 0x4a2   : > { %p1259_p11 = pneg %p1258_p10 }
 0x4a3   : > { %p1265_p0 = por %p1264_p13, %p1263_p12 }
 0x4a5   : > { %p1266_p1 = pnand %p1265_p0, %p1259_p11 }
 0x4a7   : > { %1269 = shalt.err (!%p1266_p1)
}
 0x4a8   : > { %s1270_s27 = scalar_lea.hbm %s1623_s13, 16  ;;  %s1274_s20 = scalar_lea.hbm %s1695_s5, 48 }
 0x4a9   : > { %p1271_p3 = scmp.ne.s32.totalorder %s1623_s13, %s1270_s27  ;;  %p1275_p8 = scmp.lt.s32.totalorder %s1623_s13, %s1695_s5 }
 0x4aa   : > { %p1276_p9 = scmp.lt.s32.totalorder %s1274_s20, %s1270_s27 }
 0x4ab   : > { %p1272_p4 = pnand %p1271_p3, %p1472_p5 }
 0x4ac   : > { %p1277_p10 = por %p1276_p9, %p1275_p8 }
 0x4ad   : > { %p1273_p7 = pneg %p1272_p4 }
 0x4af   : > { %p1278_p11 = pnand %p1277_p10, %p1273_p7 }
 0x4b1   : > { %1281 = shalt.err (!%p1278_p11)
}
 0x4b2   : > { %1115 = dma.vmem_to_hbm [thread:$0]  (%p1472_p5), %s831_s14, 16, %s1623_s13, %s818_s19  }
 0x4b3   : > { %s1382_s23 = smov [#allocation10]   ;;  %s1383_s24 = smov [#allocation11]  }
 0x4b4   : > { %s852_s25 = sshll.u32 %s1382_s23, 4  ;;  %s863_s26 = sshll.u32 %s1383_s24, 4  ;;  %s853_s25 = int_to_ptr.vmem [resolvable:$true] %s852_s25  ;;  %s864_s26 = int_to_ptr.vmem [resolvable:$true] %s863_s26 }
 0x4b5   : > { %s1282_s28 = scalar_lea.vmem %s853_s25, 16  ;;  %s1288_s18 = scalar_lea.vmem %s853_s25, 32 }
 0x4b6   : > { %p1283_p12 = scmp.ne.s32.totalorder %s853_s25, %s1282_s28  ;;  %p1289_p1 = scmp.lt.s32.totalorder %s853_s25, %s853_s25 }
 0x4b7   : > { %p1290_p3 = scmp.lt.s32.totalorder %s1288_s18, %s1282_s28 }
 0x4b8   : > { %p1284_p13 = pnand %p1283_p12, %p154_p2 }
 0x4b9   : > { %p1291_p4 = por %p1290_p3, %p1289_p1 }
 0x4ba   : > { %p1285_p0 = pneg %p1284_p13 }
 0x4bc   : > { %p1292_p7 = pnand %p1291_p4, %p1285_p0 }
 0x4be   : > { %1295 = shalt.err (!%p1292_p7)
}
 0x4bf   : > { %1119 = dma.vmem_to_hbm [thread:$0]  (%p154_p2), %s853_s25, 16, %s1697_s7, [#allocation9]  }
 0x4c0   : > { %s1306_s14 = scalar_lea.vmem %s864_s26, 16  ;;  %s1312_s19 = scalar_lea.vmem %s864_s26, 32 }
 0x4c1   : > { %p1307_p5 = scmp.ne.s32.totalorder %s864_s26, %s1306_s14  ;;  %p1313_p10 = scmp.lt.s32.totalorder %s864_s26, %s864_s26 }
 0x4c2   : > { %p1314_p11 = scmp.lt.s32.totalorder %s1312_s19, %s1306_s14 }
 0x4c3   : > { %p1308_p8 = pnand %p1307_p5, %p154_p2 }
 0x4c4   : > { %p1315_p12 = por %p1314_p11, %p1313_p10 }
 0x4c5   : > { %p1309_p9 = pneg %p1308_p8 }
 0x4c7   : > { %p1316_p13 = pnand %p1315_p12, %p1309_p9 }
 0x4c9   : > { %1319 = shalt.err (!%p1316_p13)
}
 0x4ca   : > { %1121 = dma.vmem_to_hbm [thread:$0]  (%p154_p2), %s864_s26, 16, %s1698_s8, [#allocation12]  }
 0x4cb   : > { %1347 = dma.done.wait (%p154_p2), [#allocation9], 32  }
 0x4cc   : > { %1349 = vsyncadd (%p154_p2), [#allocation9], 4294967264 }
 0x4cd   : > { %1351 = dma.done.wait (%p154_p2), [#allocation12], 16  }
 0x4ce   : > { %1353 = vsyncadd (%p154_p2), [#allocation12], 4294967280 }
 0x4cf PF: > { %p1139_p0 = scmp.ge.s32.totalorder %s1372_s10, 2  ;;  %s887_s20 = sand.u32 1, %s1360_s29  }
 0x4d0   : > { %s888_s21 = scalar_lea.sflag [#allocation7], %s887_s20 }
 0x4d1   : > { %p1130_p1 = pnand %p1139_p0, %p1476_p6 }
 0x4d3   : > { %p1131_p3 = pneg %p1130_p1 }
 0x4d5   : > { %1355 = dma.done.wait (%p1131_p3), %s888_s21, 16  }
 0x4d6   : > { %1357 = vsyncadd (%p1131_p3), %s888_s21, 4294967280  ;;  %p23_p4 = scmp.ge.s32.totalorder %s1457_s12, 5   ;;  %s1701_s29 = smov %s1364_s30 }
 0x4d7   : > { %s1702_s30 = smov %s1368_s9  ;;  %s1703_s9 = smov %s1468_s15 }
 0x4d8   : > { %s1704_s10 = smov %s1457_s12  ;;  %25 = sbr.rel (!%p23_p4) target bundleno = 8 (0x8), region = 107 }
 0x4dd   :  { %892 = vsyncpa [#allocation7], 1 }
 0x4de   :  { %894 = vsyncpa [#allocation7 + $0x1], 1 }
 0x4df   :  { %895 = vsyncpa [#allocation9], 1 }
 0x4e0   :  { %896 = vsyncpa [#allocation12], 1 }

</bundles_post_ra>
